<compile_context>
chip_gen: v7x
topology: tpu7x:2x2x1
jax: 0.10.0
libtpu: 0.0.40
codegen_flags: <defaults>
</compile_context>

<pallas_src>
import jax
import jax.numpy as jnp
from jax.experimental import pallas as pl
from jax.experimental.pallas import tpu as pltpu

EPS = 1e-5
IN_DIM = 784
HID = 200
OUT = 10
HID_PAD = 256   # 200 -> 256 (lane multiple of 128)
OUT_PAD = 128   # 10  -> 128 (lane multiple of 128)


def mnist_kernel(x_ref, w0_ref, w1_ref, w2_ref, vecs_ref, out_ref):
    # Packed per-feature rows (kept in f32).
    b0 = vecs_ref[0:1, :]            # [1, 256]
    gamma = vecs_ref[1:2, :]         # [1, 256]
    beta = vecs_ref[2:3, :]          # [1, 256]
    b1 = vecs_ref[3:4, :]            # [1, 256]
    b2 = vecs_ref[4:5, :OUT_PAD]     # [1, 128]

    # Cast input to bf16 in-kernel (VPU op, hidden under the matmul; avoids an
    # extra wrapper-side HBM pass).
    x = x_ref[...].astype(jnp.bfloat16)                           # [B, 784]

    # ----- fc0 + ReLU (bf16 operands on the MXU, f32 accumulation) -----
    h0 = jnp.dot(x, w0_ref[...],
                 preferred_element_type=jnp.float32) + b0         # [B, 256] f32
    h0 = jnp.maximum(h0, 0.0)

    # ----- BatchNorm1d(200), training mode (batch stats, biased variance) ----
    # Single-pass stats: mean and E[x^2] -> var; BN math stays in f32.
    inv_b = jnp.float32(1.0 / h0.shape[0])
    mean = jnp.sum(h0, axis=0, keepdims=True) * inv_b             # [1, 256]
    ex2 = jnp.sum(h0 * h0, axis=0, keepdims=True) * inv_b         # [1, 256]
    var = jnp.maximum(ex2 - mean * mean, 0.0)
    scale = gamma * jax.lax.rsqrt(var + EPS)                      # gamma*inv_std
    shift = beta - mean * scale
    a = h0 * scale + shift                                        # [B, 256]

    # ----- fc1 + ReLU -----
    h1 = jnp.dot(a.astype(jnp.bfloat16), w1_ref[...],
                 preferred_element_type=jnp.float32) + b1         # [B, 256]
    h1 = jnp.maximum(h1, 0.0)

    # ----- out (padded logits, lane-dense store) -----
    out_ref[...] = jnp.dot(h1.astype(jnp.bfloat16), w2_ref[...],
                           preferred_element_type=jnp.float32) + b2   # [B, 128]


def prepare_params(p):
    """Pad feature dims to lane multiples, cast weights to bf16 and pack the
    per-feature row vectors into a single [8, 256] f32 operand.

    Zero padding keeps the math exact: padded hidden columns stay identically
    zero through fc0/ReLU/BN (beta pad = 0, var pad = 0) and padded w1/w2
    rows/cols are zero, so logits[:, 10:] == 0 and real logits are untouched.
    """
    def pad_to(a, shape):
        out = jnp.zeros(shape, a.dtype)
        return out.at[tuple(slice(0, s) for s in a.shape)].set(a)

    w0 = pad_to(p["w0"], (IN_DIM, HID_PAD)).astype(jnp.bfloat16)
    w1 = pad_to(p["w1"], (HID_PAD, HID_PAD)).astype(jnp.bfloat16)
    w2 = pad_to(p["w2"], (HID_PAD, OUT_PAD)).astype(jnp.bfloat16)

    vecs = jnp.zeros((8, HID_PAD), jnp.float32)
    vecs = vecs.at[0, :HID].set(p["b0"].reshape(-1))
    vecs = vecs.at[1, :HID].set(p["gamma"].reshape(-1))
    vecs = vecs.at[2, :HID].set(p["beta"].reshape(-1))
    vecs = vecs.at[3, :HID].set(p["b1"].reshape(-1))
    vecs = vecs.at[4, :OUT].set(p["b2"].reshape(-1))
    return {"w0": w0, "w1": w1, "w2": w2, "vecs": vecs}


@jax.jit
def mnist_forward(x, prepared):
    """x: [B, 784] float32.  prepared: output of prepare_params."""
    B = x.shape[0]
    # Single gridless invocation with full-array VMEM operands: everything
    # fits VMEM easily and BN needs the full batch anyway.
    logits_pad = pl.pallas_call(
        mnist_kernel,
        out_shape=jax.ShapeDtypeStruct((B, OUT_PAD), jnp.float32),
        in_specs=[pl.BlockSpec(memory_space=pltpu.MemorySpace.VMEM)] * 5,
        out_specs=pl.BlockSpec(memory_space=pltpu.MemorySpace.VMEM),
    )(x, prepared["w0"], prepared["w1"], prepared["w2"], prepared["vecs"])
    return logits_pad[:, :OUT]


def init_params(key):
    """Deterministic init mimicking torch.nn.Linear default (U(-k, k), k=1/sqrt(fan_in))."""
    ks = jax.random.split(key, 6)

    def linear(kw, kb, fan_in, fan_out):
        bound = 1.0 / jnp.sqrt(jnp.float32(fan_in))
        # stored as [in, out] so the kernel computes x @ W
        w = jax.random.uniform(kw, (fan_in, fan_out), jnp.float32, -bound, bound)
        b = jax.random.uniform(kb, (1, fan_out), jnp.float32, -bound, bound)
        return w, b

    w0, b0 = linear(ks[0], ks[1], IN_DIM, HID)
    w1, b1 = linear(ks[2], ks[3], HID, HID)
    w2, b2 = linear(ks[4], ks[5], HID, OUT)
    return {
        "w0": w0, "b0": b0,
        "gamma": jnp.ones((1, HID), jnp.float32),   # BatchNorm1d weight init
        "beta": jnp.zeros((1, HID), jnp.float32),   # BatchNorm1d bias init
        "w1": w1, "b1": b1,
        "w2": w2, "b2": b2,
    }


def reference_forward_f32(x, p):
    """Pure-f32 JAX reference matching the PyTorch semantics (train-mode BN)."""
    h0 = jnp.maximum(x @ p["w0"] + p["b0"], 0.0)
    mean = jnp.mean(h0, axis=0, keepdims=True)
    var = jnp.mean((h0 - mean) ** 2, axis=0, keepdims=True)
    a = (h0 - mean) * jax.lax.rsqrt(var + EPS) * p["gamma"] + p["beta"]
    h1 = jnp.maximum(a @ p["w1"] + p["b1"], 0.0)
    return h1 @ p["w2"] + p["b2"]


def reference_forward_bf16(x, p):
    """Precision-matched reference: bf16 matmul operands, f32 accumulation/BN."""
    def mm(a, b):
        return jnp.dot(a.astype(jnp.bfloat16), b.astype(jnp.bfloat16),
                       preferred_element_type=jnp.float32)
    h0 = jnp.maximum(mm(x, p["w0"]) + p["b0"], 0.0)
    mean = jnp.mean(h0, axis=0, keepdims=True)
    var = jnp.mean((h0 - mean) ** 2, axis=0, keepdims=True)
    a = (h0 - mean) * jax.lax.rsqrt(var + EPS) * p["gamma"] + p["beta"]
    h1 = jnp.maximum(mm(a, p["w1"]) + p["b1"], 0.0)
    return mm(h1, p["w2"]) + p["b2"]


if __name__ == "__main__":
    key = jax.random.PRNGKey(0)
    k_x, k_p = jax.random.split(key)

    B = 8   # small demo batch (sublane-aligned); kernel handles any B
    x = jax.random.normal(k_x, (B, IN_DIM), jnp.float32)
    params = init_params(k_p)
    prepared = prepare_params(params)

    logits = mnist_forward(x, prepared)
    jax.block_until_ready(logits)
    assert logits.shape == (B, OUT)

    # Check against a precision-matched (bf16-operand) reference.
    ref_bf16 = reference_forward_bf16(x, params)
    assert jnp.allclose(logits, ref_bf16, atol=2e-3, rtol=2e-3), \
        "mismatch vs bf16-matched reference"

    # Check against the pure-f32 reference (only bf16 rounding error expected).
    ref_f32 = reference_forward_f32(x, params)
    assert jnp.allclose(logits, ref_f32, atol=5e-2, rtol=5e-2), \
        "mismatch vs f32 reference"

    print("KERNEL_OK")
</pallas_src>

<mosaic_0001>
module attributes {stable_mosaic.version = 11 : i64} {
  func.func @mnist_kernel(%arg0: memref<8x784xf32, #tpu.memory_space<vmem>>, %arg1: memref<784x256xbf16, #tpu.memory_space<vmem>>, %arg2: memref<256x256xbf16, #tpu.memory_space<vmem>>, %arg3: memref<256x128xbf16, #tpu.memory_space<vmem>>, %arg4: memref<8x256xf32, #tpu.memory_space<vmem>>, %arg5: memref<8x128xf32, #tpu.memory_space<vmem>>) attributes {dimension_semantics = [], scalar_prefetch = 0 : i64, scratch_operands = 0 : i64, tpu.core_type = #tpu.core_type<tc>} {
    %c0 = arith.constant 0 : index
    %c0_0 = arith.constant 0 : index
    %0 = vector.load %arg4[%c0, %c0_0] : memref<8x256xf32, #tpu.memory_space<vmem>>, vector<1x256xf32>
    %c1 = arith.constant 1 : index
    %c0_1 = arith.constant 0 : index
    %1 = vector.load %arg4[%c1, %c0_1] : memref<8x256xf32, #tpu.memory_space<vmem>>, vector<1x256xf32>
    %c2 = arith.constant 2 : index
    %c0_2 = arith.constant 0 : index
    %2 = vector.load %arg4[%c2, %c0_2] : memref<8x256xf32, #tpu.memory_space<vmem>>, vector<1x256xf32>
    %c3 = arith.constant 3 : index
    %c0_3 = arith.constant 0 : index
    %3 = vector.load %arg4[%c3, %c0_3] : memref<8x256xf32, #tpu.memory_space<vmem>>, vector<1x256xf32>
    %c4 = arith.constant 4 : index
    %c0_4 = arith.constant 0 : index
    %4 = vector.load %arg4[%c4, %c0_4] : memref<8x256xf32, #tpu.memory_space<vmem>>, vector<1x128xf32>
    %c0_5 = arith.constant 0 : index
    %c0_6 = arith.constant 0 : index
    %5 = vector.load %arg0[%c0_5, %c0_6] : memref<8x784xf32, #tpu.memory_space<vmem>>, vector<8x784xf32>
    %6 = arith.truncf %5 : vector<8x784xf32> to vector<8x784xbf16>
    %c0_7 = arith.constant 0 : index
    %c0_8 = arith.constant 0 : index
    %7 = vector.load %arg1[%c0_7, %c0_8] : memref<784x256xbf16, #tpu.memory_space<vmem>>, vector<784x256xbf16>
    %cst = arith.constant dense<0.000000e+00> : vector<8x256xf32>
    %8 = tpu.matmul %6, %7, %cst {dimension_numbers = #tpu.dot_dimension_numbers<[1], [0], [0], [1], [0, 0, 1, 1], [], []>} : vector<8x784xbf16>, vector<784x256xbf16>, vector<8x256xf32> -> vector<8x256xf32>
    %9 = vector.broadcast %0 : vector<1x256xf32> to vector<8x256xf32>
    %10 = arith.addf %8, %9 : vector<8x256xf32>
    %cst_9 = arith.constant 0.000000e+00 : f32
    %11 = vector.broadcast %cst_9 : f32 to vector<8x256xf32>
    %12 = arith.maximumf %10, %11 : vector<8x256xf32>
    %cst_10 = arith.constant dense<0.000000e+00> : vector<256xf32>
    %13 = vector.multi_reduction <add>, %12, %cst_10 [0] : vector<8x256xf32> to vector<256xf32>
    %14 = vector.shape_cast %13 : vector<256xf32> to vector<1x256xf32>
    %cst_11 = arith.constant 1.250000e-01 : f32
    %15 = vector.broadcast %cst_11 : f32 to vector<1x256xf32>
    %16 = arith.mulf %14, %15 : vector<1x256xf32>
    %17 = arith.mulf %12, %12 : vector<8x256xf32>
    %cst_12 = arith.constant dense<0.000000e+00> : vector<256xf32>
    %18 = vector.multi_reduction <add>, %17, %cst_12 [0] : vector<8x256xf32> to vector<256xf32>
    %19 = vector.shape_cast %18 : vector<256xf32> to vector<1x256xf32>
    %cst_13 = arith.constant 1.250000e-01 : f32
    %20 = vector.broadcast %cst_13 : f32 to vector<1x256xf32>
    %21 = arith.mulf %19, %20 : vector<1x256xf32>
    %22 = arith.mulf %16, %16 : vector<1x256xf32>
    %23 = arith.subf %21, %22 : vector<1x256xf32>
    %cst_14 = arith.constant 0.000000e+00 : f32
    %24 = vector.broadcast %cst_14 : f32 to vector<1x256xf32>
    %25 = arith.maximumf %23, %24 : vector<1x256xf32>
    %cst_15 = arith.constant 9.99999974E-6 : f32
    %26 = vector.broadcast %cst_15 : f32 to vector<1x256xf32>
    %27 = arith.addf %25, %26 : vector<1x256xf32>
    %28 = math.rsqrt %27 : vector<1x256xf32>
    %29 = arith.mulf %1, %28 : vector<1x256xf32>
    %30 = arith.mulf %16, %29 : vector<1x256xf32>
    %31 = arith.subf %2, %30 : vector<1x256xf32>
    %32 = vector.broadcast %29 : vector<1x256xf32> to vector<8x256xf32>
    %33 = arith.mulf %12, %32 : vector<8x256xf32>
    %34 = vector.broadcast %31 : vector<1x256xf32> to vector<8x256xf32>
    %35 = arith.addf %33, %34 : vector<8x256xf32>
    %36 = arith.truncf %35 : vector<8x256xf32> to vector<8x256xbf16>
    %c0_16 = arith.constant 0 : index
    %c0_17 = arith.constant 0 : index
    %37 = vector.load %arg2[%c0_16, %c0_17] : memref<256x256xbf16, #tpu.memory_space<vmem>>, vector<256x256xbf16>
    %cst_18 = arith.constant dense<0.000000e+00> : vector<8x256xf32>
    %38 = tpu.matmul %36, %37, %cst_18 {dimension_numbers = #tpu.dot_dimension_numbers<[1], [0], [0], [1], [0, 0, 1, 1], [], []>} : vector<8x256xbf16>, vector<256x256xbf16>, vector<8x256xf32> -> vector<8x256xf32>
    %39 = vector.broadcast %3 : vector<1x256xf32> to vector<8x256xf32>
    %40 = arith.addf %38, %39 : vector<8x256xf32>
    %cst_19 = arith.constant 0.000000e+00 : f32
    %41 = vector.broadcast %cst_19 : f32 to vector<8x256xf32>
    %42 = arith.maximumf %40, %41 : vector<8x256xf32>
    %43 = arith.truncf %42 : vector<8x256xf32> to vector<8x256xbf16>
    %c0_20 = arith.constant 0 : index
    %c0_21 = arith.constant 0 : index
    %44 = vector.load %arg3[%c0_20, %c0_21] : memref<256x128xbf16, #tpu.memory_space<vmem>>, vector<256x128xbf16>
    %cst_22 = arith.constant dense<0.000000e+00> : vector<8x128xf32>
    %45 = tpu.matmul %43, %44, %cst_22 {dimension_numbers = #tpu.dot_dimension_numbers<[1], [0], [0], [1], [0, 0, 1, 1], [], []>} : vector<8x256xbf16>, vector<256x128xbf16>, vector<8x128xf32> -> vector<8x128xf32>
    %46 = vector.broadcast %4 : vector<1x128xf32> to vector<8x128xf32>
    %47 = arith.addf %45, %46 : vector<8x128xf32>
    %c0_23 = arith.constant 0 : index
    %c0_24 = arith.constant 0 : index
    %48 = vector.load %arg5[%c0_23, %c0_24] : memref<8x128xf32, #tpu.memory_space<vmem>>, vector<8x128xf32>
    tpu.vector_store %arg5[%c0_23, %c0_24], %47 {strides = array<i32>} : memref<8x128xf32, #tpu.memory_space<vmem>>, vector<8x128xf32>,
    return
  }
}

</mosaic_0001>

<bundles_post_ra>
// kernel: mnist_forward.1
= control target key start
LH: loop header
LB: loop body
LE: loop exit
PB: predicated region body
PF: predicated region fallthrough
CT: control target
= control target key end

     0   :  { %10 = vsyncpa [#allocation3], 0  ;;  %s2106_s0 = inlined_call_operand.hbm [shape: f32[8,784], index: 0, kind: input, shape index: {}]   ;;  %s2107_s1 = inlined_call_operand.hbm [shape: bf16[784,256], index: 1, kind: input, shape index: {}]   ;;  %s2108_s2 = inlined_call_operand.hbm [shape: bf16[256,256], index: 2, kind: input, shape index: {}]   ;;  %s2109_s3 = inlined_call_operand.hbm [shape: bf16[256,128], index: 3, kind: input, shape index: {}]   ;;  %s2110_s4 = inlined_call_operand.hbm [shape: f32[8,256], index: 4, kind: input, shape index: {}]   ;;  %s2111_s5 = inlined_call_operand.hbm [shape: f32[8,128], index: 5, kind: output, shape index: {}]  }
   0x1   :  { %11 = vsyncpa [#allocation6], 0 }
   0x2   :  { %12 = vsyncpa [#allocation9], 0 }
   0x3   :  { %13 = vsyncpa [#allocation4], 0  ;;  %s1967_s18 = smov [#allocation5]   ;;  %s1827_s22 = scalar_lea.hbm %s2107_s1, 12544 }
   0x4   :  { %s29_s19 = sshll.u32 %s1967_s18, 4  ;;  %p1828_p0 = scmp.ne.s32.totalorder %s2107_s1, %s1827_s22  ;;  %s30_s19 = int_to_ptr.vmem [resolvable:$true] %s29_s19 }
   0x5   :  { %p1831_p1 = scmp.lt.u32.totalorder %s1827_s22, %s2107_s1 }
   0x7   :  { %p1833_p2 = pnand %p1831_p1, %p1828_p0 }
   0x9   :  { %1836 = shalt.err (!%p1833_p2)
}
   0xa   :  { %s1837_s27 = scalar_lea.vmem %s30_s19, 12544  ;;  %p1842_p4 = scmp.lt.s32.totalorder %s30_s19, %s30_s19 }
   0xb   :  { %p1838_p3 = scmp.ne.s32.totalorder %s30_s19, %s1837_s27  ;;  %p1843_p5 = scmp.lt.s32.totalorder %s1837_s27, %s1837_s27 }
   0xd   :  { %p1844_p6 = por %p1843_p5, %p1842_p4 }
   0xf   :  { %p1845_p7 = pnand %p1844_p6, %p1838_p3 }
  0x11   :  { %1848 = shalt.err (!%p1845_p7)
}
  0x12   :  { %s1968_s28 = smov 128   ;;  %s1969_s29 = smov 8  }
  0x13   :  { %35 = dma.hbm_to_vmem [thread:$0]  %s2107_s1, 12544, %s30_s19, [#allocation6], %s1968_s28, %s1968_s28, %s1969_s29  }
  0x14   :  { %s1970_s7 = smov [#allocation8]   ;;  %s1849_s11 = scalar_lea.hbm %s2109_s3, 2048 }
  0x15   :  { %s53_s8 = sshll.u32 %s1970_s7, 4  ;;  %p1850_p8 = scmp.ne.s32.totalorder %s2109_s3, %s1849_s11  ;;  %s54_s8 = int_to_ptr.vmem [resolvable:$true] %s53_s8 }
  0x16   :  { %p1853_p9 = scmp.lt.u32.totalorder %s1849_s11, %s2109_s3 }
  0x18   :  { %p1855_p10 = pnand %p1853_p9, %p1850_p8 }
  0x1a   :  { %1858 = shalt.err (!%p1855_p10)
}
  0x1b   :  { %s1859_s16 = scalar_lea.vmem %s54_s8, 2048  ;;  %p1864_p12 = scmp.lt.s32.totalorder %s54_s8, %s54_s8 }
  0x1c   :  { %p1860_p11 = scmp.ne.s32.totalorder %s54_s8, %s1859_s16  ;;  %p1865_p13 = scmp.lt.s32.totalorder %s1859_s16, %s1859_s16 }
  0x1e   :  { %p1866_p0 = por %p1865_p13, %p1864_p12 }
  0x20   :  { %p1867_p1 = pnand %p1866_p0, %p1860_p11 }
  0x22   :  { %1870 = shalt.err (!%p1867_p1)
}
  0x23   :  { %s1971_s1 = smov 64   ;;  %s1972_s17 = smov 4  }
  0x24   :  { %59 = dma.hbm_to_vmem [thread:$0]  %s2109_s3, 2048, %s54_s8, [#allocation9], %s1971_s1, %s1971_s1, %s1972_s17  }
  0x25   :  { %s1973_s20 = smov [#allocation2]   ;;  %s1974_s22 = smov [#allocation7]  }
  0x26   :  { %s20_s21 = sshll.u32 %s1973_s20, 4  ;;  %s41_s23 = sshll.u32 %s1974_s22, 4  ;;  %s21_s21 = int_to_ptr.vmem [resolvable:$true] %s20_s21  ;;  %s2036_s23 = int_to_ptr.vmem [resolvable:$true] %s41_s23 }
  0x27   :  { %s1871_s26 = scalar_lea.hbm %s2106_s0, 896 }
  0x28   :  { %p1872_p2 = scmp.ne.s32.totalorder %s2106_s0, %s1871_s26  ;;  %p1875_p3 = scmp.lt.u32.totalorder %s1871_s26, %s2106_s0 }
  0x2a   :  { %p1877_p4 = pnand %p1875_p3, %p1872_p2 }
  0x2c   :  { %1880 = shalt.err (!%p1877_p4)
}
  0x2d   :  { %s1881_s3 = scalar_lea.vmem %s21_s21, 896  ;;  %p1886_p6 = scmp.lt.s32.totalorder %s21_s21, %s21_s21 }
  0x2e   :  { %p1882_p5 = scmp.ne.s32.totalorder %s21_s21, %s1881_s3  ;;  %p1887_p7 = scmp.lt.s32.totalorder %s1881_s3, %s1881_s3 }
  0x30   :  { %p1888_p8 = por %p1887_p7, %p1886_p6 }
  0x32   :  { %p1889_p9 = pnand %p1888_p8, %p1882_p5 }
  0x34   :  { %1892 = shalt.err (!%p1889_p9)
}
  0x35   :  { %23 = dma.hbm_to_vmem [thread:$0]  %s2106_s0, 896, %s21_s21, [#allocation3]  }
  0x36   :  { %s1893_s12 = scalar_lea.hbm %s2108_s2, 4096 }
  0x37   :  { %p1894_p10 = scmp.ne.s32.totalorder %s2108_s2, %s1893_s12  ;;  %p1897_p11 = scmp.lt.u32.totalorder %s1893_s12, %s2108_s2 }
  0x39   :  { %p1899_p12 = pnand %p1897_p11, %p1894_p10 }
  0x3b   :  { %1902 = shalt.err (!%p1899_p12)
}
  0x3c   :  { %s1903_s1 = scalar_lea.vmem %s2036_s23, 4096  ;;  %p1908_p0 = scmp.lt.s32.totalorder %s2036_s23, %s2036_s23 }
  0x3d   :  { %p1904_p13 = scmp.ne.s32.totalorder %s2036_s23, %s1903_s1  ;;  %p1909_p1 = scmp.lt.s32.totalorder %s1903_s1, %s1903_s1 }
  0x3f   :  { %p1910_p2 = por %p1909_p1, %p1908_p0 }
  0x41   :  { %p1911_p3 = pnand %p1910_p2, %p1904_p13 }
  0x43   :  { %1914 = shalt.err (!%p1911_p3)
}
  0x44   :  { %47 = dma.hbm_to_vmem [thread:$0]  %s2108_s2, 4096, %s2036_s23, [#allocation6], %s1968_s28, %s1968_s28, %s1969_s29  }
  0x45   :  { %s1975_s18 = smov [#allocation10]   ;;  %s1915_s22 = scalar_lea.hbm %s2110_s4, 256 }
  0x46   :  { %s66_s19 = sshll.u32 %s1975_s18, 4  ;;  %p1916_p4 = scmp.ne.s32.totalorder %s2110_s4, %s1915_s22  ;;  %s67_s19 = int_to_ptr.vmem [resolvable:$true] %s66_s19 }
  0x47   :  { %p1919_p5 = scmp.lt.u32.totalorder %s1915_s22, %s2110_s4 }
  0x49   :  { %p1921_p6 = pnand %p1919_p5, %p1916_p4 }
  0x4b   :  { %1924 = shalt.err (!%p1921_p6)
}
  0x4c   :  { %s1925_s30 = scalar_lea.vmem %s67_s19, 256  ;;  %p1930_p8 = scmp.lt.s32.totalorder %s67_s19, %s67_s19 }
  0x4d   :  { %p1926_p7 = scmp.ne.s32.totalorder %s67_s19, %s1925_s30  ;;  %p1931_p9 = scmp.lt.s32.totalorder %s1925_s30, %s1925_s30 }
  0x4f   :  { %p1932_p10 = por %p1931_p9, %p1930_p8 }
  0x51   :  { %p1933_p11 = pnand %p1932_p10, %p1926_p7 }
  0x53   :  { %1936 = shalt.err (!%p1933_p11)
}
  0x54   :  { %69 = dma.hbm_to_vmem [thread:$0]  %s2110_s4, 256, %s67_s19, [#allocation9]  }
  0x55   :  { %1959 = dma.done.wait [#allocation3], 896  }
  0x56   :  { %1960 = vsyncadd [#allocation3], 4294966400 }
  0x57   :  { %1961 = dma.done.wait [#allocation6], 16640  }
  0x58   :  { %1962 = vsyncadd [#allocation6], 4294950656 }
  0x59   :  { %1963 = dma.done.wait [#allocation9], 2304  }
  0x5a   :  { %1964 = vsyncadd [#allocation9], 4294964992  ;;  %v1612_v0 = vld [vmem:[#allocation5 + $0x104] ss:$8 sps:$4 sm:$0xff]   ;;  %v1614_v1 = vld [vmem:[#allocation5 + $0x100] ss:$8 sps:$4 sm:$0xff]  }
  0x5b   :  { %752 = vmatprep.subr.bf16.mxu0 %v1612_v0  ;;  %v1615_v2 = vld [vmem:[#allocation5 + $0x114] ss:$8 sps:$4 sm:$0xff]   ;;  %v1617_v3 = vld [vmem:[#allocation5 + $0x110] ss:$8 sps:$4 sm:$0xff]   ;;  %v1618_v4 = vld [vmem:[#allocation5 + $0x124] ss:$8 sps:$4 sm:$0xff]  }
  0x5c   :  { %753 = vmatpush1.bf16.msra.mxu0 %v1614_v1  ;;  %v1620_v5 = vld [vmem:[#allocation5 + $0x120] ss:$8 sps:$4 sm:$0xff]   ;;  %v1621_v6 = vld [vmem:[#allocation5 + $0x134] ss:$8 sps:$4 sm:$0xff]   ;;  %v1623_v7 = vld [vmem:[#allocation5 + $0x130] ss:$8 sps:$4 sm:$0xff]  }
  0x5d   :  { %754 = vmatprep.subr.bf16.mxu0 %v1615_v2  ;;  %v1624_v8 = vld [vmem:[#allocation5 + $0x144] ss:$8 sps:$4 sm:$0xff]   ;;  %v1626_v9 = vld [vmem:[#allocation5 + $0x140] ss:$8 sps:$4 sm:$0xff]   ;;  %v1627_v10 = vld [vmem:[#allocation5 + $0x154] ss:$8 sps:$4 sm:$0xff]  }
  0x5e   :  { %v1629_v11 = vld [vmem:[#allocation5 + $0x150] ss:$8 sps:$4 sm:$0xff]   ;;  %v1630_v12 = vld [vmem:[#allocation5 + $0x164] ss:$8 sps:$4 sm:$0xff]   ;;  %v1632_v15 = vld [vmem:[#allocation5 + $0x160] ss:$8 sps:$4 sm:$0xff]  }
  0x5f   :  { %v97_v13 = vld [vmem:[#allocation2 + $0x18] sm:$0xff]  ;;  %v1633_v16 = vld [vmem:[#allocation5 + $0x174] ss:$8 sps:$4 sm:$0xff]   ;;  %v1635_v18 = vld [vmem:[#allocation5 + $0x170] ss:$8 sps:$4 sm:$0xff]   ;;  %vm707_vm0 = vcmask 130048  }
  0x60   :  { %755 = vmatpush1.bf16.msra.mxu0 %v1617_v3  ;;  %v104_v14 = vpack.c.bf16 %v97_v13, %v97_v13  ;;  %v1666_v17 = vld [vmem:[#allocation5 + $0x4] ss:$8 sps:$4 sm:$0xff]   ;;  %v1671_v20 = vld [vmem:[#allocation5] ss:$8 sps:$4 sm:$0xff]   ;;  %v1672_v21 = vld [vmem:[#allocation5 + $0x14] ss:$8 sps:$4 sm:$0xff]  }
  0x61   :  { %756 = vmatprep.subr.bf16.mxu0 %v1618_v4  ;;  %v1636_v19 = vld [vmem:[#allocation5 + $0x184] ss:$8 sps:$4 sm:$0xff]   ;;  %711 = vmatprep.subr.bf16.mxu1 %v1666_v17  ;;  %v1677_v22 = vld [vmem:[#allocation5 + $0x10] ss:$8 sps:$4 sm:$0xff]   ;;  %v1638_v24 = vld [vmem:[#allocation5 + $0x180] ss:$8 sps:$4 sm:$0xff]  }
  0x62   :  { %784 = vmatprep.mubr.bf16.mxu0 %v104_v14  ;;  %712 = vmatpush1.bf16.msra.mxu1 %v1671_v20  ;;  %v1678_v23 = vld [vmem:[#allocation5 + $0x24] ss:$8 sps:$4 sm:$0xff]   ;;  %v1639_v25 = vld [vmem:[#allocation5 + $0x194] ss:$8 sps:$4 sm:$0xff]   ;;  %v1683_v26 = vld [vmem:[#allocation5 + $0x20] ss:$8 sps:$4 sm:$0xff]  }
  0x63   :  { %713 = vmatprep.subr.bf16.mxu1 %v1672_v21  ;;  %v1684_v27 = vld [vmem:[#allocation5 + $0x34] ss:$8 sps:$4 sm:$0xff]   ;;  %v1641_v28 = vld [vmem:[#allocation5 + $0x190] ss:$8 sps:$4 sm:$0xff]   ;;  %v1642_v29 = vld [vmem:[#allocation5 + $0x1a4] ss:$8 sps:$4 sm:$0xff]  }
  0x64   :  { %757 = vmatpush1.bf16.msra.mxu0 %v1620_v5  ;;  %v1689_v30 = vld [vmem:[#allocation5 + $0x30] ss:$8 sps:$4 sm:$0xff]   ;;  %v1690_v31 = vld [vmem:[#allocation5 + $0x44] ss:$8 sps:$4 sm:$0xff]   ;;  %v1644_v32 = vld [vmem:[#allocation5 + $0x1a0] ss:$8 sps:$4 sm:$0xff]  }
  0x65   :  { %758 = vmatprep.subr.bf16.mxu0 %v1621_v6  ;;  %v1645_v33 = vld [vmem:[#allocation5 + $0x1b4] ss:$8 sps:$4 sm:$0xff]   ;;  %v1695_v34 = vld [vmem:[#allocation5 + $0x40] ss:$8 sps:$4 sm:$0xff]   ;;  %v1647_v36 = vld [vmem:[#allocation5 + $0x1b0] ss:$8 sps:$4 sm:$0xff]  }
  0x66   :  { %714 = vmatpush1.bf16.msra.mxu1 %v1677_v22  ;;  %v1696_v35 = vld [vmem:[#allocation5 + $0x54] ss:$8 sps:$4 sm:$0xff]   ;;  %v1648_v37 = vld [vmem:[#allocation5 + $0x1c4] ss:$8 sps:$4 sm:$0xff]   ;;  %v1701_v38 = vld [vmem:[#allocation5 + $0x50] ss:$8 sps:$4 sm:$0xff]  }
  0x67   :  { %715 = vmatprep.subr.bf16.mxu1 %v1678_v23  ;;  %v1702_v39 = vld [vmem:[#allocation5 + $0x64] ss:$8 sps:$4 sm:$0xff]   ;;  %v1650_v40 = vld [vmem:[#allocation5 + $0x1c0] ss:$8 sps:$4 sm:$0xff]   ;;  %v1651_v41 = vld [vmem:[#allocation5 + $0x1d4] ss:$8 sps:$4 sm:$0xff]  }
  0x68   :  { %759 = vmatpush1.bf16.msra.mxu0 %v1623_v7  ;;  %v1707_v42 = vld [vmem:[#allocation5 + $0x60] ss:$8 sps:$4 sm:$0xff]   ;;  %v1708_v43 = vld [vmem:[#allocation5 + $0x74] ss:$8 sps:$4 sm:$0xff]   ;;  %v1653_v44 = vld [vmem:[#allocation5 + $0x1d0] ss:$8 sps:$4 sm:$0xff]  }
  0x69   :  { %760 = vmatprep.subr.bf16.mxu0 %v1624_v8  ;;  %v1654_v45 = vld [vmem:[#allocation5 + $0x1e4] ss:$8 sps:$4 sm:$0xff]   ;;  %v1713_v46 = vld [vmem:[#allocation5 + $0x70] ss:$8 sps:$4 sm:$0xff]   ;;  %v1656_v48 = vld [vmem:[#allocation5 + $0x1e0] ss:$8 sps:$4 sm:$0xff]  }
  0x6a   :  { %716 = vmatpush1.bf16.msra.mxu1 %v1683_v26  ;;  %v1714_v47 = vld [vmem:[#allocation5 + $0x84] ss:$8 sps:$4 sm:$0xff]   ;;  %v1657_v49 = vld [vmem:[#allocation5 + $0x1f4] ss:$8 sps:$4 sm:$0xff]   ;;  %v1719_v50 = vld [vmem:[#allocation5 + $0x80] ss:$8 sps:$4 sm:$0xff]  }
  0x6b   :  { %717 = vmatprep.subr.bf16.mxu1 %v1684_v27  ;;  %v1659_v51 = vld [vmem:[#allocation5 + $0x1f0] ss:$8 sps:$4 sm:$0xff]   ;;  %v1720_v52 = vld [vmem:[#allocation5 + $0x94] ss:$8 sps:$4 sm:$0xff]   ;;  %v1662_v54 = vld [vmem:[#allocation5 + $0x204] ss:$8 sps:$4 sm:$0xff]  }
  0x6c   :  { %761 = vmatpush1.bf16.msra.mxu0 %v1626_v9  ;;  %v96_v53 = vld [vmem:[#allocation2 + $0x10] sm:$0xff]  ;;  %v1726_v56 = vld [vmem:[#allocation5 + $0xa4] ss:$8 sps:$4 sm:$0xff]   ;;  %v99_v58 = vld [vmem:[#allocation2 + $0x28] sm:$0xff]  ;;  %s1978_s4 = smov [#allocation11]  }
  0x6d   :  { %762 = vmatprep.subr.bf16.mxu0 %v1627_v10  ;;  %v1725_v55 = vld [vmem:[#allocation5 + $0x90] ss:$8 sps:$4 sm:$0xff]   ;;  %v103_v57 = vpack.c.bf16 %v96_v53, %v96_v53  ;;  %v1660_v59 = vld [vmem:[#allocation5 + $0x200] ss:$8 sps:$4 sm:$0xff]   ;;  %v106_v60 = vpack.c.bf16 %v99_v58, %v99_v58  ;;  %v1665_v61 = vld [vmem:[#allocation5 + $0x214] ss:$8 sps:$4 sm:$0xff]  }
  0x6e   :  { %718 = vmatpush1.bf16.msra.mxu1 %v1689_v30  ;;  %v1731_v62 = vld [vmem:[#allocation5 + $0xa0] ss:$8 sps:$4 sm:$0xff]   ;;  %v1732_v63 = vld [vmem:[#allocation5 + $0xb4] ss:$8 sps:$4 sm:$0xff]   ;;  %v1663_v1 = vld [vmem:[#allocation5 + $0x210] ss:$8 sps:$4 sm:$0xff]  }
  0x6f   :  { %719 = vmatprep.subr.bf16.mxu1 %v1690_v31  ;;  %v95_v0 = vld [vmem:[#allocation2 + $0x8] sm:$0xff]  ;;  %v1670_v2 = vld [vmem:[#allocation5 + $0x224] ss:$8 sps:$4 sm:$0xff]   ;;  %v1668_v6 = vld [vmem:[#allocation5 + $0x220] ss:$8 sps:$4 sm:$0xff]   ;;  %s1408_s29 = sshll.u32 %s1978_s4, 4  ;;  %s1409_s29 = int_to_ptr.vmem [resolvable:$true] %s1408_s29 }
  0x70   :  { %763 = vmatpush1.bf16.msra.mxu0 %v1629_v11  ;;  %v1737_v3 = vld [vmem:[#allocation5 + $0xb0] ss:$8 sps:$4 sm:$0xff]   ;;  %v102_v4 = vpack.c.bf16 %v95_v0, %v95_v0  ;;  %v1738_v5 = vld [vmem:[#allocation5 + $0xc4] ss:$8 sps:$4 sm:$0xff]   ;;  %v1676_v7 = vld [vmem:[#allocation5 + $0x234] ss:$8 sps:$4 sm:$0xff]   ;;  %p1942_p13 = scmp.lt.s32.totalorder %s1409_s29, %s1409_s29 }
  0x71   :  { %764 = vmatprep.subr.bf16.mxu0 %v1630_v12  ;;  %v1743_v8 = vld [vmem:[#allocation5 + $0xc0] ss:$8 sps:$4 sm:$0xff]   ;;  %v1744_v9 = vld [vmem:[#allocation5 + $0xd4] ss:$8 sps:$4 sm:$0xff]   ;;  %v1674_v10 = vld [vmem:[#allocation5 + $0x230] ss:$8 sps:$4 sm:$0xff]  }
  0x72   :  { %720 = vmatpush1.bf16.msra.mxu1 %v1695_v34  ;;  %743 = vmatprep.mubr.bf16.mxu1 %v102_v4  ;;  %v1682_v11 = vld [vmem:[#allocation5 + $0x244] ss:$8 sps:$4 sm:$0xff]   ;;  %v1749_v12 = vld [vmem:[#allocation5 + $0xd0] ss:$8 sps:$4 sm:$0xff]   ;;  %v1680_v14 = vld [vmem:[#allocation5 + $0x240] ss:$8 sps:$4 sm:$0xff]  }
  0x73   :  { %721 = vmatprep.subr.bf16.mxu1 %v1696_v35  ;;  %v1750_v13 = vld [vmem:[#allocation5 + $0xe4] ss:$8 sps:$4 sm:$0xff]   ;;  %v1756_v17 = vld [vmem:[#allocation5 + $0xf4] ss:$8 sps:$4 sm:$0xff]   ;;  %v1758_v20 = vld [vmem:[#allocation5 + $0xf0] ss:$8 sps:$4 sm:$0xff]  }
  0x74   :  { %765 = vmatpush1.bf16.msra.mxu0 %v1632_v15  ;;  %v1688_v15 = vld [vmem:[#allocation5 + $0x254] ss:$8 sps:$4 sm:$0xff]   ;;  %v94_v21 = vld [vmem:[#allocation2] sm:$0xff]  ;;  %v1771_v58 = vld [vmem:[#allocation7 + $0x40] ss:$8 sps:$4 sm:$0xff]   ;;  %s1937_s23 = scalar_lea.vmem %s1409_s29, 128 }
  0x75   :  { %766 = vmatprep.subr.bf16.mxu0 %v1633_v16  ;;  %v1755_v16 = vld [vmem:[#allocation5 + $0xe0] ss:$8 sps:$4 sm:$0xff]   ;;  %v1700_v23 = vld [vmem:[#allocation5 + $0x274] ss:$8 sps:$4 sm:$0xff]   ;;  %v1706_v26 = vld [vmem:[#allocation5 + $0x284] ss:$8 sps:$4 sm:$0xff]   ;;  %p1938_p12 = scmp.ne.s32.totalorder %s1409_s29, %s1937_s23  ;;  %p1943_p0 = scmp.lt.s32.totalorder %s1937_s23, %s1937_s23 }
  0x76   :  { %722 = vmatpush1.bf16.msra.mxu1 %v1701_v38  ;;  %v1692_v22 = vld [vmem:[#allocation5 + $0x260] ss:$8 sps:$4 sm:$0xff]   ;;  %v1718_v30 = vld [vmem:[#allocation5 + $0x2a4] ss:$8 sps:$4 sm:$0xff]   ;;  %v1767_v53 = vld [vmem:[#allocation7 + $0x24] ss:$8 sps:$4 sm:$0xff]  }
  0x77   :  { %723 = vmatprep.subr.bf16.mxu1 %v1702_v39  ;;  %v1704_v27 = vld [vmem:[#allocation5 + $0x280] ss:$8 sps:$4 sm:$0xff]   ;;  %v1730_v34 = vld [vmem:[#allocation5 + $0x2c4] ss:$8 sps:$4 sm:$0xff]   ;;  %p1944_p1 = por %p1943_p0, %p1942_p13 }
  0x78   :  { %767 = vmatpush1.bf16.msra.mxu0 %v1635_v18  ;;  %v1686_v18 = vld [vmem:[#allocation5 + $0x250] ss:$8 sps:$4 sm:$0xff]   ;;  %v1716_v31 = vld [vmem:[#allocation5 + $0x2a0] ss:$8 sps:$4 sm:$0xff]   ;;  %v1742_v38 = vld [vmem:[#allocation5 + $0x2e4] ss:$8 sps:$4 sm:$0xff]  }
  0x79   :  { %768 = vmatprep.subr.bf16.mxu0 %v1636_v19  ;;  %v1694_v19 = vld [vmem:[#allocation5 + $0x264] ss:$8 sps:$4 sm:$0xff]   ;;  %v1728_v35 = vld [vmem:[#allocation5 + $0x2c0] ss:$8 sps:$4 sm:$0xff]   ;;  %p1945_p2 = pnand %p1944_p1, %p1938_p12 }
  0x7a   :  { %724 = vmatpush1.bf16.msra.mxu1 %v1707_v42  ;;  %v1740_v39 = vld [vmem:[#allocation5 + $0x2e0] ss:$8 sps:$4 sm:$0xff]   ;;  %v1782_v0 = vld [vmem:[#allocation7 + $0x74] ss:$8 sps:$4 sm:$0xff]  }
  0x7b   :  { %725 = vmatprep.subr.bf16.mxu1 %v1708_v43  ;;  %v98_v42 = vld [vmem:[#allocation2 + $0x20] sm:$0xff] }
  0x7c   :  { %769 = vmatpush1.bf16.msra.mxu0 %v1638_v24  ;;  %v101_v24 = vpack.c.bf16 %v94_v21, %v94_v21  ;;  %v1754_v43 = vld [vmem:[#allocation5 + $0x304] ss:$8 sps:$4 sm:$0xff]   ;;  %v1786_v4 = vld [vmem:[#allocation7 + $0x90] ss:$8 sps:$4 sm:$0xff]  }
  0x7d   :  { %770 = vmatprep.subr.bf16.mxu0 %v1639_v25  ;;  %v1698_v25 = vld [vmem:[#allocation5 + $0x270] ss:$8 sps:$4 sm:$0xff]  }
  0x7e   :  { %726 = vmatpush1.bf16.msra.mxu1 %v1713_v46  ;;  %v1976_v46 = vmov 0  }
  0x7f   :  { %727 = vmatprep.subr.bf16.mxu1 %v1714_v47  ;;  %v100_v47 = vld [vmem:[#allocation2 + $0x30] sm:$0xff] }
  0x80   :  { %771 = vmatpush1.bf16.msra.mxu0 %v1641_v28  ;;  %v1712_v28 = vld [vmem:[#allocation5 + $0x294] ss:$8 sps:$4 sm:$0xff]  }
  0x81   :  { %772 = vmatprep.subr.bf16.mxu0 %v1642_v29  ;;  %v1710_v29 = vld [vmem:[#allocation5 + $0x290] ss:$8 sps:$4 sm:$0xff]  }
  0x82   :  { %728 = vmatpush1.bf16.msra.mxu1 %v1719_v50  ;;  %v1759_v50 = vld [vmem:[#allocation7] ss:$8 sps:$4 sm:$0xff]  }
  0x83   :  { %729 = vmatprep.subr.bf16.mxu1 %v1720_v52  ;;  %v1762_v52 = vld [vmem:[#allocation7 + $0x10] ss:$8 sps:$4 sm:$0xff]  }
  0x84   :  { %773 = vmatpush1.bf16.msra.mxu0 %v1644_v32  ;;  %v1724_v32 = vld [vmem:[#allocation5 + $0x2b4] ss:$8 sps:$4 sm:$0xff]  }
  0x85   :  { %774 = vmatprep.subr.bf16.mxu0 %v1645_v33  ;;  %v1722_v33 = vld [vmem:[#allocation5 + $0x2b0] ss:$8 sps:$4 sm:$0xff]  }
  0x86   :  { %730 = vmatpush1.bf16.msra.mxu1 %v1725_v55  ;;  %v1770_v55 = vld [vmem:[#allocation7 + $0x34] ss:$8 sps:$4 sm:$0xff]  }
  0x87   :  { %731 = vmatprep.subr.bf16.mxu1 %v1726_v56  ;;  %v1768_v56 = vld [vmem:[#allocation7 + $0x30] ss:$8 sps:$4 sm:$0xff]  }
  0x88   :  { %775 = vmatpush1.bf16.msra.mxu0 %v1647_v36  ;;  %v1736_v36 = vld [vmem:[#allocation5 + $0x2d4] ss:$8 sps:$4 sm:$0xff]  }
  0x89   :  { %776 = vmatprep.subr.bf16.mxu0 %v1648_v37  ;;  %v1734_v37 = vld [vmem:[#allocation5 + $0x2d0] ss:$8 sps:$4 sm:$0xff]  }
  0x8a   :  { %732 = vmatpush1.bf16.msra.mxu1 %v1731_v62  ;;  %v1777_v62 = vld [vmem:[#allocation7 + $0x60] ss:$8 sps:$4 sm:$0xff]  }
  0x8b   :  { %733 = vmatprep.subr.bf16.mxu1 %v1732_v63  ;;  %v1780_v63 = vld [vmem:[#allocation7 + $0x70] ss:$8 sps:$4 sm:$0xff]  }
  0x8c   :  { %777 = vmatpush1.bf16.msra.mxu0 %v1650_v40  ;;  %v1748_v40 = vld [vmem:[#allocation5 + $0x2f4] ss:$8 sps:$4 sm:$0xff]  }
  0x8d   :  { %778 = vmatprep.subr.bf16.mxu0 %v1651_v41  ;;  %v1746_v41 = vld [vmem:[#allocation5 + $0x2f0] ss:$8 sps:$4 sm:$0xff]  }
  0x8e   :  { %734 = vmatpush1.bf16.msra.mxu1 %v1737_v3  ;;  %v1788_v3 = vld [vmem:[#allocation7 + $0x94] ss:$8 sps:$4 sm:$0xff]  }
  0x8f   :  { %735 = vmatprep.subr.bf16.mxu1 %v1738_v5  ;;  %v1791_v5 = vld [vmem:[#allocation7 + $0xa4] ss:$8 sps:$4 sm:$0xff]  }
  0x90   :  { %779 = vmatpush1.bf16.msra.mxu0 %v1653_v44  ;;  %v105_v44 = vpack.c.bf16 %v98_v42, %v98_v42 }
  0x91   :  { %780 = vmatprep.subr.bf16.mxu0 %v1654_v45  ;;  %v1752_v45 = vld [vmem:[#allocation5 + $0x300] ss:$8 sps:$4 sm:$0xff]  }
  0x92   :  { %736 = vmatpush1.bf16.msra.mxu1 %v1743_v8  ;;  %v1792_v8 = vld [vmem:[#allocation7 + $0xb0] ss:$8 sps:$4 sm:$0xff]  }
  0x93   :  { %737 = vmatprep.subr.bf16.mxu1 %v1744_v9  ;;  %v1797_v9 = vld [vmem:[#allocation7 + $0xc4] ss:$8 sps:$4 sm:$0xff]  }
  0x94   :  { %781 = vmatpush1.bf16.msra.mxu0 %v1656_v48  ;;  %v107_v48 = vpack.c.bf16 %v100_v47, %v100_v47 }
  0x95   :  { %782 = vmatprep.subr.bf16.mxu0 %v1657_v49  ;;  %v1761_v49 = vld [vmem:[#allocation7 + $0x4] ss:$8 sps:$4 sm:$0xff]  }
  0x96   :  { %738 = vmatpush1.bf16.msra.mxu1 %v1749_v12  ;;  %v1798_v12 = vld [vmem:[#allocation7 + $0xd0] ss:$8 sps:$4 sm:$0xff]  }
  0x97   :  { %739 = vmatprep.subr.bf16.mxu1 %v1750_v13  ;;  %v1803_v13 = vld [vmem:[#allocation7 + $0xe4] ss:$8 sps:$4 sm:$0xff]  }
  0x98   :  { %783 = vmatpush1.bf16.msra.mxu0 %v1659_v51  ;;  %v1764_v51 = vld [vmem:[#allocation7 + $0x14] ss:$8 sps:$4 sm:$0xff]  }
  0x99   :  { %793 = vmatprep.subr.bf16.mxu0 %v1662_v54  ;;  %v1765_v54 = vld [vmem:[#allocation7 + $0x20] ss:$8 sps:$4 sm:$0xff]  }
  0x9a   :  { %740 = vmatpush1.bf16.msra.mxu1 %v1755_v16  ;;  %v1804_v16 = vld [vmem:[#allocation7 + $0xf0] ss:$8 sps:$4 sm:$0xff]  }
  0x9b   :  { %785 = vmatmul.mubr.bf16.vlgmr.msra.gmra.mrb[0].mxu0 %v103_v57  ;;  %741 = vmatprep.subr.bf16.mxu1 %v1756_v17  ;;  %v1773_v57 = vld [vmem:[#allocation7 + $0x44] ss:$8 sps:$4 sm:$0xff]  }
  0x9c   :  { %794 = vmatpush1.bf16.msra.mxu0 %v1660_v59  ;;  %825 = vmatprep.mubr.bf16.mxu0 %v106_v60  ;;  %v1776_v59 = vld [vmem:[#allocation7 + $0x54] ss:$8 sps:$4 sm:$0xff]   ;;  %v1774_v60 = vld [vmem:[#allocation7 + $0x50] ss:$8 sps:$4 sm:$0xff]   ;;  %v1807_v17 = vld [vmem:[#allocation8 + $0x40] sm:$0xff]  }
  0x9d   :  { %795 = vmatprep.subr.bf16.mxu0 %v1665_v61  ;;  %v1779_v61 = vld [vmem:[#allocation7 + $0x64] ss:$8 sps:$4 sm:$0xff]  }
  0x9e   :  { %742 = vmatpush1.bf16.msra.mxu1 %v1758_v20 }
  0x9f   :  { %1188 = vmatprep.subr.bf16.mxu1 %v1761_v49 }
  0xa0   :  { %796 = vmatpush1.bf16.msra.mxu0 %v1663_v1  ;;  %v1785_v1 = vld [vmem:[#allocation7 + $0x84] ss:$8 sps:$4 sm:$0xff]  }
  0xa1   :  { %797 = vmatprep.subr.bf16.mxu0 %v1670_v2  ;;  %744 = vmatmul.mubr.bf16.vlgmr.msra.gmra.mrb[0].mxu1 %v101_v24  ;;  %v1783_v2 = vld [vmem:[#allocation7 + $0x80] ss:$8 sps:$4 sm:$0xff]  }
  0xa2   :  { %1189 = vmatpush1.bf16.msra.mxu1 %v1759_v50 }
  0xa3   :  { %1190 = vmatprep.subr.bf16.mxu1 %v1764_v51 }
  0xa4   :  { %798 = vmatpush1.bf16.msra.mxu0 %v1668_v6  ;;  %v1789_v6 = vld [vmem:[#allocation7 + $0xa0] ss:$8 sps:$4 sm:$0xff]  }
  0xa5   :  { %799 = vmatprep.subr.bf16.mxu0 %v1676_v7  ;;  %v1794_v7 = vld [vmem:[#allocation7 + $0xb4] ss:$8 sps:$4 sm:$0xff]  }
  0xa6   :  { %1191 = vmatpush1.bf16.msra.mxu1 %v1762_v52 }
  0xa7   :  { %1192 = vmatprep.subr.bf16.mxu1 %v1767_v53 }
  0xa8   :  { %800 = vmatpush1.bf16.msra.mxu0 %v1674_v10  ;;  %v1795_v10 = vld [vmem:[#allocation7 + $0xc0] ss:$8 sps:$4 sm:$0xff]  }
  0xa9   :  { %801 = vmatprep.subr.bf16.mxu0 %v1682_v11  ;;  %v1800_v11 = vld [vmem:[#allocation7 + $0xd4] ss:$8 sps:$4 sm:$0xff]  }
  0xaa   :  { %1193 = vmatpush1.bf16.msra.mxu1 %v1765_v54 }
  0xab   :  { %1194 = vmatprep.subr.bf16.mxu1 %v1770_v55 }
  0xac   :  { %802 = vmatpush1.bf16.msra.mxu0 %v1680_v14  ;;  %v1801_v14 = vld [vmem:[#allocation7 + $0xe0] ss:$8 sps:$4 sm:$0xff]  }
  0xad   :  { %803 = vmatprep.subr.bf16.mxu0 %v1688_v15  ;;  %v1806_v15 = vld [vmem:[#allocation7 + $0xf4] ss:$8 sps:$4 sm:$0xff]  }
  0xae   :  { %1195 = vmatpush1.bf16.msra.mxu1 %v1768_v56 }
  0xaf   :  { %1196 = vmatprep.subr.bf16.mxu1 %v1773_v57 }
  0xb0   :  { %804 = vmatpush1.bf16.msra.mxu0 %v1686_v18 }
  0xb1   :  { %805 = vmatprep.subr.bf16.mxu0 %v1694_v19 }
  0xb2   :  { %1197 = vmatpush1.bf16.msra.mxu1 %v1771_v58 }
  0xb3   :  { %1198 = vmatprep.subr.bf16.mxu1 %v1776_v59 }
  0xb4   :  { %806 = vmatpush1.bf16.msra.mxu0 %v1692_v22  ;;  %v207_v22 = vlaneseq }
  0xb5   :  { %807 = vmatprep.subr.bf16.mxu0 %v1700_v23 }
  0xb6   :  { %1199 = vmatpush1.bf16.msra.mxu1 %v1774_v60  ;;  %v208_v23 = vshrl.u32 %v207_v22, 7 }
  0xb7   :  { %1200 = vmatprep.subr.bf16.mxu1 %v1779_v61 }
  0xb8   :  { %808 = vmatpush1.bf16.msra.mxu0 %v1698_v25  ;;  %v2082_v24 = vsub.s32 0, %v208_v23  ;;  %v86_v25 = vld [vmem:[#allocation10] ss:$8 sm:$0x3] }
  0xb9   :  { %809 = vmatprep.subr.bf16.mxu0 %v1706_v26  ;;  %v2084_v26 = vsub.s32 1, %v208_v23 }
  0xba   :  { %1201 = vmatpush1.bf16.msra.mxu1 %v1777_v62 }
  0xbb   :  { %1202 = vmatprep.subr.bf16.mxu1 %v1782_v0 }
  0xbc   :  { %810 = vmatpush1.bf16.msra.mxu0 %v1704_v27  ;;  %v210_v27 = vrot.slane %v86_v25, %v2082_v24 }
  0xbd   :  { %811 = vmatprep.subr.bf16.mxu0 %v1712_v28  ;;  %v214_v28 = vrot.slane %v86_v25, %v2084_v26 }
  0xbe   :  { %1203 = vmatpush1.bf16.msra.mxu1 %v1780_v63 }
  0xbf   :  { %1204 = vmatprep.subr.bf16.mxu1 %v1785_v1 }
  0xc0   :  { %812 = vmatpush1.bf16.msra.mxu0 %v1710_v29 }
  0xc1   :  { %813 = vmatprep.subr.bf16.mxu0 %v1718_v30 }
  0xc2   :  { %1205 = vmatpush1.bf16.msra.mxu1 %v1783_v2 }
  0xc3   :  { %1206 = vmatprep.subr.bf16.mxu1 %v1788_v3 }
  0xc4   :  { %814 = vmatpush1.bf16.msra.mxu0 %v1716_v31 }
  0xc5   :  { %815 = vmatprep.subr.bf16.mxu0 %v1724_v32 }
  0xc6   :  { %1207 = vmatpush1.bf16.msra.mxu1 %v1786_v4 }
  0xc7   :  { %1208 = vmatprep.subr.bf16.mxu1 %v1791_v5 }
  0xc8   :  { %816 = vmatpush1.bf16.msra.mxu0 %v1722_v33 }
  0xc9   :  { %817 = vmatprep.subr.bf16.mxu0 %v1730_v34 }
  0xca   :  { %1209 = vmatpush1.bf16.msra.mxu1 %v1789_v6 }
  0xcb   :  { %1210 = vmatprep.subr.bf16.mxu1 %v1794_v7 }
  0xcc   :  { %818 = vmatpush1.bf16.msra.mxu0 %v1728_v35 }
  0xcd   :  { %819 = vmatprep.subr.bf16.mxu0 %v1736_v36 }
  0xce   :  { %1211 = vmatpush1.bf16.msra.mxu1 %v1792_v8 }
  0xcf   :  { %1212 = vmatprep.subr.bf16.mxu1 %v1797_v9 }
  0xd0   :  { %820 = vmatpush1.bf16.msra.mxu0 %v1734_v37 }
  0xd1   :  { %821 = vmatprep.subr.bf16.mxu0 %v1742_v38 }
  0xd2   :  { %1213 = vmatpush1.bf16.msra.mxu1 %v1795_v10 }
  0xd3   :  { %1214 = vmatprep.subr.bf16.mxu1 %v1800_v11 }
  0xd4   :  { %822 = vmatpush1.bf16.msra.mxu0 %v1740_v39 }
  0xd5   :  { %823 = vmatprep.subr.bf16.mxu0 %v1748_v40 }
  0xd6   :  { %1215 = vmatpush1.bf16.msra.mxu1 %v1798_v12 }
  0xd7   :  { %1216 = vmatprep.subr.bf16.mxu1 %v1803_v13  ;;  %v1977_v13 = vmov 1966171168  }
  0xd8   :  { %824 = vmatpush1.bf16.msra.mxu0 %v1746_v41 }
  0xd9   :  { %834 = vmatprep.subr.bf16.mxu0 %v1754_v43 }
  0xda   :  { %1217 = vmatpush1.bf16.msra.mxu1 %v1801_v14  ;;  %v921_v14 = vunpack.c.l.s4 %v1977_v13 }
  0xdb   :  { %826 = vmatmul.mubr.bf16.vlgmr.msra.gmra.mrb[0].mxu0 %v105_v44  ;;  %1218 = vmatprep.subr.bf16.mxu1 %v1806_v15 }
  0xdc   :  { %835 = vmatpush1.bf16.msra.mxu0 %v1752_v45  ;;  %866 = vmatprep.mubr.bf16.mxu0 %v1976_v46  ;;  %v922_v15 = vunpack.c.0.s8 %v921_v14 }
  0xde   :  { %1219 = vmatpush1.bf16.msra.mxu1 %v1804_v16 }
  0xdf   :  { %1566 = vmatprep.subr.bf16.mxu1 %v1807_v17  ;;  %v925_v17 = vsub.s32 %v922_v15, %v208_v23 }
  0xe7   :  { %1517 = vmatmul.mubr.msk.bf16.vlgmr.msra.gmra.mrb[0].mxu0 %vm707_vm0, %v107_v48 }
 0x174   :  { %v745_v18 = vpop.f32.mrb[0].mxu1 }
 0x175   :  { %v747_v19 = vpop.f32.mrb[1].mxu1  ;;  %v746_v29 = vadd.f32 %v745_v18, %v210_v27 }
 0x176   :  { %v749_v20 = vpop.f32.mrb[2].mxu1  ;;  %v748_v30 = vadd.f32 %v747_v19, %v214_v28 }
 0x177   :  { %v750_v21 = vpop.f32.mrb[3].mxu1 }
 0x178   :  { %v88_v21 = vld [vmem:[#allocation10 + $0x1] ss:$8 sm:$0x3] }
 0x1ba   :  { %v868_v31 = vpop.f32.mrb[0].mxu0 }
 0x1bb   :  { %v1589_v32 = vadd.f32 %v868_v31, %v746_v29  ;;  %v870_v33 = vpop.f32.mrb[1].mxu0 }
 0x1bc   :  { %v1591_v34 = vadd.f32 %v870_v33, %v748_v30  ;;  %v872_v35 = vpop.f32.mrb[2].mxu0 }
 0x1bd   :  { %v875_v36 = vmax.f32 %v1589_v32, 0.0  ;;  %v873_v37 = vpop.f32.mrb[3].mxu0  ;;  %v90_v35 = vld [vmem:[#allocation10 + $0x2] ss:$8 sm:$0x3] }
 0x1be   :  { %v876_v38 = vmax.f32 %v1591_v34, 0.0 }
 0x1bf   :  { %v877_v39 = vrot.slane %v875_v36, 4  ;;  %v891_v40 = vmul.f32 %v875_v36, %v875_v36 }
 0x1c0   :  { %v883_v41 = vrot.slane %v876_v38, 4  ;;  %v892_v42 = vmul.f32 %v876_v38, %v876_v38 }
 0x1c1   :  { %v878_v43 = vadd.f32 %v877_v39, %v875_v36  ;;  %v893_v44 = vrot.slane %v891_v40, 4 }
 0x1c2   :  { %v884_v45 = vadd.f32 %v883_v41, %v876_v38  ;;  %v899_v46 = vrot.slane %v892_v42, 4 }
 0x1c3   :  { %v879_v47 = vrot.slane %v878_v43, 2  ;;  %v894_v48 = vadd.f32 %v893_v44, %v891_v40 }
 0x1c4   :  { %v885_v49 = vrot.slane %v884_v45, 2  ;;  %v900_v50 = vadd.f32 %v899_v46, %v892_v42  ;;  %v1809_v46 = vld [vmem:[#allocation8 + $0x48] sm:$0xff]  }
 0x1c5   :  { %v880_v51 = vadd.f32 %v879_v47, %v878_v43  ;;  %v895_v52 = vrot.slane %v894_v48, 2  ;;  %v1812_v47 = vld [vmem:[#allocation8 + $0x10] sm:$0xff]  }
 0x1c6   :  { %v886_v53 = vadd.f32 %v885_v49, %v884_v45  ;;  %v901_v54 = vrot.slane %v900_v50, 2  ;;  %v1808_v45 = vld [vmem:[#allocation8] sm:$0xff]   ;;  %v1814_v49 = vld [vmem:[#allocation8 + $0x18] sm:$0xff]  }
 0x1c7   :  { %v881_v55 = vrot.slane %v880_v51, 1  ;;  %v896_v56 = vadd.f32 %v895_v52, %v894_v48  ;;  %v1813_v48 = vld [vmem:[#allocation8 + $0x58] sm:$0xff]   ;;  %v1817_v52 = vld [vmem:[#allocation8 + $0x68] sm:$0xff]  }
 0x1c8   :  { %v887_v57 = vrot.slane %v886_v53, 1  ;;  %v902_v58 = vadd.f32 %v901_v54, %v900_v50  ;;  %v1815_v50 = vld [vmem:[#allocation8 + $0x60] sm:$0xff]   ;;  %v1819_v54 = vld [vmem:[#allocation8 + $0x70] sm:$0xff]  }
 0x1c9   :  { %v882_v59 = vadd.f32 %v881_v55, %v880_v51  ;;  %v897_v60 = vrot.slane %v896_v56, 1  ;;  %v1816_v51 = vld [vmem:[#allocation8 + $0x20] sm:$0xff]   ;;  %v1820_v55 = vld [vmem:[#allocation8 + $0x30] sm:$0xff]  }
 0x1ca   :  { %v903_v61 = vrot.slane %v902_v58, 1  ;;  %v888_v62 = vadd.f32 %v887_v57, %v886_v53  ;;  %v1818_v53 = vld [vmem:[#allocation8 + $0x28] sm:$0xff]   ;;  %v1822_v57 = vld [vmem:[#allocation8 + $0x38] sm:$0xff]  }
 0x1cb   :  { %v889_v63 = vmul.f32 0.125, %v882_v59  ;;  %v898_v0 = vadd.f32 %v897_v60, %v896_v56  ;;  %v1821_v56 = vld [vmem:[#allocation8 + $0x78] sm:$0xff]  }
 0x1cc   :  { %v904_v1 = vadd.f32 %v903_v61, %v902_v58  ;;  %v890_v2 = vmul.f32 0.125, %v888_v62  ;;  %v92_v58 = vld [vmem:[#allocation10 + $0x3] ss:$8 sm:$0x3] }
 0x1cd   :  { %v905_v3 = vmul.f32 0.125, %v898_v0  ;;  %v907_v4 = vmul.f32 %v889_v63, %v889_v63  ;;  %v1021_v59 = vrot.slane %v92_v58, %v2082_v24  ;;  %v1025_v60 = vrot.slane %v92_v58, %v2084_v26 }
 0x1ce   :  { %v906_v5 = vmul.f32 0.125, %v904_v1  ;;  %v908_v6 = vmul.f32 %v890_v2, %v890_v2 }
 0x1cf   :  { %v909_v7 = vsub.f32 %v905_v3, %v907_v4 }
 0x1d0   :  { %v910_v8 = vsub.f32 %v906_v5, %v908_v6 }
 0x1d1   :  { %v911_v9 = vmax.f32 %v909_v7, 0.0 }
 0x1d2   :  { %v912_v10 = vmax.f32 %v910_v8, 0.0  ;;  %v93_v8 = vld [vmem:[#allocation10 + $0x4] ss:$0 sm:$0xff] }
 0x1d3   :  { %v913_v11 = vadd.f32 1e-05, %v911_v9 }
 0x1d4   :  { %v914_v12 = vadd.f32 1e-05, %v912_v10 }
 0x1d5   :  { %1823 = vrsqrt.f32 %v913_v11 }
 0x1d6   :  { %1825 = vrsqrt.f32 %v914_v12 }
 0x1df   :  { %v1824_v16 = vpop.eup %1823 }
 0x1e0   :  { %v1826_v18 = vpop.eup %1825 }
 0x1e1   :  { %v919_v19 = vcombine.low %v1824_v16, %v1826_v18 }
 0x1e3   :  { %v926_v20 = vrot.slane %v919_v19, %v925_v17 }
 0x1e5   :  { %v933_v22 = vrot.slane %v926_v20, %v925_v17 }
 0x1e7   :  { %v935_v25 = vmul.f32 %v933_v22, %v88_v21 }
 0x1e9   :  { %v940_v27 = vrot.slane %v935_v25, %v2082_v24  ;;  %v944_v28 = vrot.slane %v935_v25, %v2084_v26 }
 0x1eb   :  { %v947_v29 = vmul.f32 %v940_v27, %v889_v63  ;;  %v948_v30 = vmul.f32 %v944_v28, %v890_v2  ;;  %v969_v31 = vmul.f32 %v944_v28, %v876_v38  ;;  %v968_v32 = vmul.f32 %v940_v27, %v875_v36  ;;  %v1810_v38 = vld [vmem:[#allocation8 + $0x8] sm:$0xff]   ;;  %v1811_v36 = vld [vmem:[#allocation8 + $0x50] sm:$0xff]  }
 0x1ed   :  { %v951_v33 = vcombine.low %v947_v29, %v948_v30 }
 0x1ef   :  { %v958_v34 = vrot.slane %v951_v33, %v925_v17 }
 0x1f1   :  { %v965_v37 = vrot.slane %v958_v34, %v925_v17 }
 0x1f3   :  { %v967_v39 = vsub.f32 %v90_v35, %v965_v37 }
 0x1f5   :  { %v978_v23 = vrot.slane %v967_v39, %v2084_v26  ;;  %v974_v40 = vrot.slane %v967_v39, %v2082_v24 }
 0x1f7   :  { %v982_v41 = vadd.f32 %v978_v23, %v969_v31  ;;  %v981_v42 = vadd.f32 %v974_v40, %v968_v32 }
 0x1f9   :  { %v984_v43 = vpack.c.bf16 %v982_v41, %v982_v41  ;;  %v983_v44 = vpack.c.bf16 %v981_v42, %v981_v42 }
 0x1fb   :  { %1220 = vmatprep.mubr.bf16.mxu1 %v984_v43 }
 0x1fc   :  { %1221 = vmatmul.mubr.bf16.vlgmr.msra.gmra.mrb[4].mxu1 %v983_v44 }
 0x1fd   :  { %1567 = vmatpush3.bf16.msra.mxu1 %v1808_v45 }
 0x1fe   :  { %1568 = vmatprep.subr.bf16.mxu1 %v1809_v46 }
 0x201   :  { %1569 = vmatpush3.bf16.msra.mxu1 %v1810_v38 }
 0x202   :  { %1570 = vmatprep.subr.bf16.mxu1 %v1811_v36 }
 0x205   :  { %1571 = vmatpush3.bf16.msra.mxu1 %v1812_v47 }
 0x206   :  { %1572 = vmatprep.subr.bf16.mxu1 %v1813_v48 }
 0x209   :  { %1573 = vmatpush3.bf16.msra.mxu1 %v1814_v49 }
 0x20a   :  { %1574 = vmatprep.subr.bf16.mxu1 %v1815_v50 }
 0x20d   :  { %1575 = vmatpush3.bf16.msra.mxu1 %v1816_v51 }
 0x20e   :  { %1576 = vmatprep.subr.bf16.mxu1 %v1817_v52 }
 0x211   :  { %1577 = vmatpush3.bf16.msra.mxu1 %v1818_v53 }
 0x212   :  { %1578 = vmatprep.subr.bf16.mxu1 %v1819_v54 }
 0x215   :  { %1579 = vmatpush3.bf16.msra.mxu1 %v1820_v55 }
 0x216   :  { %1580 = vmatprep.subr.bf16.mxu1 %v1821_v56 }
 0x219   :  { %1581 = vmatpush3.bf16.msra.mxu1 %v1822_v57 }
 0x2cf   :  { %v1222_v61 = vpop.f32.mrb[4].mxu1 }
 0x2d0   :  { %v1223_v62 = vadd.f32 %v1222_v61, %v1021_v59  ;;  %v1224_v63 = vpop.f32.mrb[5].mxu1 }
 0x2d1   :  { %v1225_v0 = vadd.f32 %v1224_v63, %v1025_v60  ;;  %v1226_v1 = vpop.f32.mrb[6].mxu1 }
 0x2d2   :  { %v1229_v2 = vmax.f32 %v1223_v62, 0.0  ;;  %v1227_v3 = vpop.f32.mrb[7].mxu1 }
 0x2d3   :  { %v1230_v4 = vmax.f32 %v1225_v0, 0.0 }
 0x2d4   :  { %v1231_v6 = vpack.c.bf16 %v1229_v2, %v1229_v2 }
 0x2d5   :  { %v1232_v5 = vpack.c.bf16 %v1230_v4, %v1230_v4 }
 0x2d7   :  { %1393 = vmatprep.mubr.bf16.mxu1 %v1232_v5 }
 0x2d8   :  { %1394 = vmatmul.mubr.bf16.vlgmr.msra.gmra.mrb[8].mxu1 %v1231_v6 }
 0x3ab   :  { %v1582_v7 = vpop.f32.mrb[8].mxu1 }
 0x3ac   :  { %v1583_v9 = vpop.f32.mrb[9].mxu1 }
 0x3ad   :  { %v1584_v24 = vadd.f32 %v1583_v9, %v1582_v7  ;;  %v1585_v10 = vpop.f32.mrb[10].mxu1 }
 0x3ae   :  { %v1586_v26 = vpop.f32.mrb[11].mxu1 }
 0x3af   :  { %v1396_v11 = vadd.f32 %v1584_v24, %v93_v8 }
 0x3b1   :  { %1401 = vst [vmem:[#allocation11] sm:$0xff] %v1396_v11 }
 0x3b2   :  { %1948 = shalt.err (!%p1945_p2)
}
 0x3b3   :  { %s1949_s3 = scalar_lea.hbm %s2111_s5, 128 }
 0x3b4   :  { %p1950_p3 = scmp.ne.s32.totalorder %s2111_s5, %s1949_s3  ;;  %p1953_p4 = scmp.lt.u32.totalorder %s1949_s3, %s2111_s5 }
 0x3b6   :  { %p1955_p5 = pnand %p1953_p4, %p1950_p3 }
 0x3b8   :  { %1958 = shalt.err (!%p1955_p5)
}
 0x3b9   :  { %1411 = dma.vmem_to_hbm [thread:$0]  %s1409_s29, 128, %s2111_s5, [#allocation4]  }
 0x3ba   :  { %1965 = dma.done.wait [#allocation4], 128  }
 0x3bb   :  { %1966 = vsyncadd [#allocation4], 4294967168 }
 0x3bc   :  { %1415 = vsyncpa [#allocation3], 1 }
 0x3bd   :  { %1416 = vsyncpa [#allocation6], 1 }
 0x3be   :  { %1417 = vsyncpa [#allocation9], 1 }
 0x3bf   :  { %1418 = vsyncpa [#allocation4], 1 }

</bundles_post_ra>
